<compile_context>
chip_gen: v5e
topology: v5e:2x2
jax: 0.10.0
libtpu: 0.0.40
codegen_flags: <defaults>
</compile_context>

<pallas_src>
import functools
import math

import jax
import jax.numpy as jnp
from jax import lax
from jax.experimental import pallas as pl
from jax.experimental.pallas import tpu as pltpu


@functools.lru_cache(maxsize=None)
def _vmem_limit_bytes():
    """Per-generation scoped-VMEM limit (v5e/v6e: 128 MiB phys, v7x: 64 MiB)."""
    limit = 48 * 1024 * 1024          # safe default for v7x's 64 MiB physical VMEM
    try:
        info = pltpu.get_tpu_info()
        cap = getattr(info, "vmem_capacity_bytes", None)
        if cap:
            limit = min(int(cap * 3 // 4), 100 * 1024 * 1024)
    except Exception:
        pass
    return limit


def _pick_tile(dim, target, unit):
    """Largest tile <= target that divides `dim` and is a multiple of `unit`;
    falls back to the full dim (a full-extent block is always layout-legal)."""
    if dim <= target:
        return dim
    t = (target // unit) * unit
    while t >= unit:
        if dim % t == 0:
            return t
        t -= unit
    # TODO(synk): pad/mask truly ragged dims with a pl.cdiv grid instead of
    # falling back to one full-dim block (could exceed VMEM for huge dims).
    return dim


# ----------------------------------------------------------------------------
# Linear projection kernel:  y = x @ w_t + b   with w_t pre-transposed (K, N).
# Grid (M_tiles, N_tiles, K_tiles): M/N "parallel", K "arbitrary" (innermost)
# with an f32 VMEM accumulator.  bf16 MXU operands, f32 accumulation.
# ----------------------------------------------------------------------------
def _linear_kernel(x_ref, w_ref, b_ref, o_ref, acc_ref):
    k = pl.program_id(2)

    @pl.when(k == 0)
    def _init():
        acc_ref[...] = jnp.zeros_like(acc_ref)

    acc_ref[...] += jnp.dot(
        x_ref[...].astype(jnp.bfloat16),      # no-op if already bf16
        w_ref[...],                           # cast to bf16 once in the wrapper
        preferred_element_type=jnp.float32,
    )

    @pl.when(k == pl.num_programs(2) - 1)
    def _finalize():
        o_ref[...] = (acc_ref[...] + b_ref[...]).astype(o_ref.dtype)


def pallas_linear(x, w_t, b, *, out_dtype=jnp.float32,
                  tile_m=512, tile_n=512, tile_k=512):
    """x: (M, K), w_t: (K, N) (pre-transposed), b: (N,) -> (M, N) = x @ w_t + b."""
    M, K = x.shape
    K2, N = w_t.shape
    assert K2 == K
    tm = _pick_tile(M, tile_m, 8)       # second-to-last dims: multiples of 8
    tn = _pick_tile(N, tile_n, 128)     # lane dims: multiples of 128 (or full)
    tk = _pick_tile(K, tile_k, 128)
    w_bf = w_t.astype(jnp.bfloat16)     # one cast per call; halves weight traffic
    b2 = b.reshape(1, N)
    return pl.pallas_call(
        _linear_kernel,
        out_shape=jax.ShapeDtypeStruct((M, N), out_dtype),
        grid=(M // tm, N // tn, K // tk),
        in_specs=[
            pl.BlockSpec((tm, tk), lambda i, j, k: (i, k)),
            pl.BlockSpec((tk, tn), lambda i, j, k: (k, j)),
            pl.BlockSpec((1, tn), lambda i, j, k: (0, j)),
        ],
        out_specs=pl.BlockSpec((tm, tn), lambda i, j, k: (i, j)),
        scratch_shapes=[pltpu.VMEM((tm, tn), jnp.float32)],
        compiler_params=pltpu.CompilerParams(
            dimension_semantics=("parallel", "parallel", "arbitrary"),
            vmem_limit_bytes=_vmem_limit_bytes(),
        ),
    )(x, w_bf, b2)


# ----------------------------------------------------------------------------
# Sigmoid attention (flash-style over the key axis; no running max needed
# because sigmoid is bounded).  bf16 matmuls, f32 accumulation/elementwise.
# ----------------------------------------------------------------------------
def _attn_tile(q_ref, k_ref, v_ref, scale):
    """One (T, tile_s) tile: returns (attn_f32, pv_f32, denom_f32)."""
    q = q_ref[0, 0].astype(jnp.bfloat16)          # (T, D)
    k = k_ref[0, 0].astype(jnp.bfloat16)          # (ts, D)
    v = v_ref[0, 0].astype(jnp.bfloat16)          # (ts, D)
    scores = lax.dot_general(
        q, k, dimension_numbers=(((1,), (1,)), ((), ())),
        preferred_element_type=jnp.float32) * scale          # (T, ts) f32
    attn = jax.nn.sigmoid(scores)                             # f32 (EUP)
    pv = jnp.dot(attn.astype(jnp.bfloat16), v,
                 preferred_element_type=jnp.float32)          # (T, D) f32
    den = jnp.sum(attn, axis=-1, keepdims=True)               # (T, 1) f32
    return attn, pv, den


def _attn_kernel_nw(q_ref, k_ref, v_ref, o_ref, acc_ref, den_ref, *, scale):
    """need_weights=False.  Grid (B, H, S_tiles); acc/den scratch per (b, h)."""
    s_idx = pl.program_id(2)
    _, pv, den = _attn_tile(q_ref, k_ref, v_ref, scale)

    @pl.when(s_idx == 0)
    def _init():
        acc_ref[...] = pv
        den_ref[...] = den

    @pl.when(s_idx > 0)
    def _accumulate():
        acc_ref[...] += pv
        den_ref[...] += den

    @pl.when(s_idx == pl.num_programs(2) - 1)
    def _finalize():
        inv = pl.reciprocal(den_ref[...] + 1e-4, approx=True)
        o_ref[0, 0] = (acc_ref[...] * inv).astype(o_ref.dtype)


def _attn_kernel_w(q_ref, k_ref, v_ref, o_ref, w_ref, acc_ref, den_ref,
                   *, scale, inv_heads):
    """need_weights=True.  Grid (B, S_tiles, H): h innermost so the (1, T, ts)
    weights block stays resident while the head average accumulates; per-head
    PV/denominator accumulators live in (H, T, D)/(H, T, 1) scratch."""
    s_idx = pl.program_id(1)
    h_idx = pl.program_id(2)

    attn, pv, den = _attn_tile(q_ref, k_ref, v_ref, scale)

    @pl.when(s_idx == 0)
    def _init():
        acc_ref[h_idx] = pv
        den_ref[h_idx] = den

    @pl.when(s_idx > 0)
    def _accumulate():
        acc_ref[h_idx] += pv
        den_ref[h_idx] += den

    # Head-averaged attention weights, accumulated over the innermost h axis.
    @pl.when(h_idx == 0)
    def _w_init():
        w_ref[0] = attn * inv_heads

    @pl.when(h_idx > 0)
    def _w_accumulate():
        w_ref[0] += attn * inv_heads

    @pl.when(s_idx == pl.num_programs(1) - 1)
    def _finalize():
        inv = pl.reciprocal(den_ref[h_idx] + 1e-4, approx=True)
        o_ref[0, h_idx] = (acc_ref[h_idx] * inv).astype(o_ref.dtype)


def pallas_sigmoid_attention(q, k, v, *, need_weights=True, tile_s=512):
    """q: (B, H, T, D), k/v: (B, H, S, D) ->
       (out (B, H, T, D), head-averaged weights (B, T, S) or None)."""
    B, H, T, D = q.shape
    S = k.shape[2]
    scale = 1.0 / math.sqrt(D)

    def cparams(sem):
        return pltpu.CompilerParams(dimension_semantics=sem,
                                    vmem_limit_bytes=_vmem_limit_bytes())

    if need_weights:
        # Weights output (B, T, S) is S-tiled, so its tile must be a multiple
        # of 128 lanes (or the full S).
        ts = _pick_tile(S, tile_s, 128)
        ns = S // ts
        kernel = functools.partial(_attn_kernel_w, scale=scale, inv_heads=1.0 / H)
        out, attn_avg = pl.pallas_call(
            kernel,
            out_shape=(jax.ShapeDtypeStruct((B, H, T, D), q.dtype),
                       jax.ShapeDtypeStruct((B, T, S), jnp.float32)),
            grid=(B, ns, H),
            in_specs=[
                pl.BlockSpec((1, 1, T, D), lambda b, s, h: (b, h, 0, 0)),
                pl.BlockSpec((1, 1, ts, D), lambda b, s, h: (b, h, s, 0)),
                pl.BlockSpec((1, 1, ts, D), lambda b, s, h: (b, h, s, 0)),
            ],
            out_specs=(
                pl.BlockSpec((1, H, T, D), lambda b, s, h: (b, 0, 0, 0)),
                pl.BlockSpec((1, T, ts), lambda b, s, h: (b, 0, s)),
            ),
            scratch_shapes=[pltpu.VMEM((H, T, D), jnp.float32),
                            pltpu.VMEM((H, T, 1), jnp.float32)],
            compiler_params=cparams(("parallel", "arbitrary", "arbitrary")),
        )(q, k, v)
        return out, attn_avg

    ts = _pick_tile(S, tile_s, 8)
    ns = S // ts
    # TODO(synk): pl.Buffered(3) on the K/V specs for v7x if the DMA is exposed.
    kernel = functools.partial(_attn_kernel_nw, scale=scale)
    out = pl.pallas_call(
        kernel,
        out_shape=jax.ShapeDtypeStruct((B, H, T, D), q.dtype),
        grid=(B, H, ns),
        in_specs=[
            pl.BlockSpec((1, 1, T, D), lambda b, h, s: (b, h, 0, 0)),
            pl.BlockSpec((1, 1, ts, D), lambda b, h, s: (b, h, s, 0)),
            pl.BlockSpec((1, 1, ts, D), lambda b, h, s: (b, h, s, 0)),
        ],
        out_specs=pl.BlockSpec((1, 1, T, D), lambda b, h, s: (b, h, 0, 0)),
        scratch_shapes=[pltpu.VMEM((T, D), jnp.float32),
                        pltpu.VMEM((T, 1), jnp.float32)],
        compiler_params=cparams(("parallel", "parallel", "arbitrary")),
    )(q, k, v)
    return out, None


# ----------------------------------------------------------------------------
# SMHA module (params + orchestration in plain JAX, hot paths in Pallas)
# ----------------------------------------------------------------------------
def init_smha_params(key, embed_dim):
    k1, k2 = jax.random.split(key)
    # xavier_uniform_ for in_proj_weight (3E, E): bound = sqrt(6 / (E + 3E))
    bound_in = math.sqrt(6.0 / (4 * embed_dim))
    in_w = jax.random.uniform(k1, (3 * embed_dim, embed_dim), jnp.float32,
                              -bound_in, bound_in)
    # nn.Linear default weight init (kaiming_uniform, a=sqrt(5)): bound = 1/sqrt(E)
    bound_out = 1.0 / math.sqrt(embed_dim)
    out_w = jax.random.uniform(k2, (embed_dim, embed_dim), jnp.float32,
                               -bound_out, bound_out)
    # Store pre-transposed (one-time, init-side) so every matmul is (M,K)x(K,N).
    return dict(
        in_proj_weight_t=in_w.T,                               # (E, 3E)
        in_proj_bias=jnp.zeros((3 * embed_dim,), jnp.float32),
        out_proj_weight_t=out_w.T,                             # (E, E)
        out_proj_bias=jnp.zeros((embed_dim,), jnp.float32),
    )


def smha_forward(params, query, key, value, num_heads, need_weights=True,
                 attn_tile_s=512):
    """query: (tgt_len, bsz, E); key/value: (src_len, bsz, E) (PyTorch MHA layout)."""
    tgt_len, bsz, E = query.shape
    src_len = key.shape[0]
    H = num_heads
    head_dim = E // H

    w_t = params["in_proj_weight_t"]      # (E, 3E)
    b = params["in_proj_bias"]            # (3E,)

    if (query is key) and (key is value):
        # Fused QKV projection: one (M, E) @ (E, 3E) matmul, bf16 output.
        qkv = pallas_linear(query.reshape(tgt_len * bsz, E), w_t, b,
                            out_dtype=jnp.bfloat16)            # (M, 3E)
        q_p, k_p, v_p = qkv[:, :E], qkv[:, E:2 * E], qkv[:, 2 * E:]
        k_len = tgt_len
    else:
        q_p = pallas_linear(query.reshape(tgt_len * bsz, E),
                            w_t[:, :E], b[:E], out_dtype=jnp.bfloat16)
        k_p = pallas_linear(key.reshape(src_len * bsz, E),
                            w_t[:, E:2 * E], b[E:2 * E], out_dtype=jnp.bfloat16)
        v_p = pallas_linear(value.reshape(src_len * bsz, E),
                            w_t[:, 2 * E:], b[2 * E:], out_dtype=jnp.bfloat16)
        k_len = src_len

    # (L*B, E) -> (B, H, L, head_dim)   (matches torch view + transpose(0, 1));
    # activations are bf16 now, so this XLA copy moves half the bytes it used to.
    q4 = q_p.reshape(tgt_len, bsz, H, head_dim).transpose(1, 2, 0, 3)
    k4 = k_p.reshape(k_len, bsz, H, head_dim).transpose(1, 2, 0, 3)
    v4 = v_p.reshape(k_len, bsz, H, head_dim).transpose(1, 2, 0, 3)

    attn_output, attn_weights = pallas_sigmoid_attention(
        q4, k4, v4, need_weights=need_weights, tile_s=attn_tile_s)

    # (B, H, T, D) -> (T*B, E), then the output projection back to f32.
    ao = attn_output.transpose(2, 0, 1, 3).reshape(tgt_len * bsz, E)
    out = pallas_linear(ao, params["out_proj_weight_t"], params["out_proj_bias"],
                        out_dtype=jnp.float32).reshape(tgt_len, bsz, E)

    if need_weights:
        return out, attn_weights          # already head-averaged (B, T, S)
    return out, None


# ----------------------------------------------------------------------------
# Reference (pure JAX, f32) for sanity checks
# ----------------------------------------------------------------------------
def smha_reference(params, query, key, value, num_heads):
    tgt_len, bsz, E = query.shape
    src_len = key.shape[0]
    head_dim = E // num_heads
    w = params["in_proj_weight_t"].T      # (3E, E)
    b = params["in_proj_bias"]
    q = query @ w[:E].T + b[:E]
    k = key @ w[E:2 * E].T + b[E:2 * E]
    v = value @ w[2 * E:].T + b[2 * E:]
    q = q.reshape(tgt_len, bsz * num_heads, head_dim).transpose(1, 0, 2)
    k = k.reshape(src_len, bsz * num_heads, head_dim).transpose(1, 0, 2)
    v = v.reshape(src_len, bsz * num_heads, head_dim).transpose(1, 0, 2)
    scores = jnp.einsum("bqd,bkd->bqk", q / math.sqrt(head_dim), k)
    attn = jax.nn.sigmoid(scores)
    out = jnp.einsum("bqk,bkd->bqd",
                     attn / (attn.sum(-1, keepdims=True) + 1e-4), v)
    out = out.transpose(1, 0, 2).reshape(tgt_len, bsz, E)
    out = out @ params["out_proj_weight_t"] + params["out_proj_bias"]
    aw = attn.reshape(bsz, num_heads, tgt_len, src_len).sum(1) / num_heads
    return out, aw


if __name__ == "__main__":
    embed_dim = 32
    num_heads = 4
    tgt_len = 8
    src_len = 8
    bsz = 2

    # bf16 MXU operands + approx reciprocal => loosened tolerances vs f32 ref.
    ATOL, RTOL = 5e-2, 5e-2
    W_ATOL, W_RTOL = 3e-2, 3e-2

    root = jax.random.PRNGKey(0)
    kp, kq, kk_, kbig = jax.random.split(root, 4)
    params = init_smha_params(kp, embed_dim)

    # --- self-attention (fused QKV path), with weights ---
    x = jax.random.normal(kq, (tgt_len, bsz, embed_dim), jnp.float32)
    out, attn_w = smha_forward(params, x, x, x, num_heads, need_weights=True)
    out = jax.block_until_ready(out)
    attn_w = jax.block_until_ready(attn_w)
    ref_out, ref_w = smha_reference(params, x, x, x, num_heads)
    assert out.shape == (tgt_len, bsz, embed_dim)
    assert attn_w.shape == (bsz, tgt_len, src_len)
    assert jnp.allclose(out, ref_out, atol=ATOL, rtol=RTOL)
    assert jnp.allclose(attn_w, ref_w, atol=W_ATOL, rtol=W_RTOL)

    # --- self-attention, need_weights=False ---
    out_nw, none_w = smha_forward(params, x, x, x, num_heads, need_weights=False)
    out_nw = jax.block_until_ready(out_nw)
    assert none_w is None
    assert jnp.allclose(out_nw, ref_out, atol=ATOL, rtol=RTOL)

    # --- cross-attention (non-fused projection path) ---
    y = jax.random.normal(kk_, (src_len, bsz, embed_dim), jnp.float32)
    out_x, attn_x = smha_forward(params, x, y, y, num_heads, need_weights=True)
    out_x = jax.block_until_ready(out_x)
    ref_out_x, ref_w_x = smha_reference(params, x, y, y, num_heads)
    assert jnp.allclose(out_x, ref_out_x, atol=ATOL, rtol=RTOL)
    assert jnp.allclose(attn_x, ref_w_x, atol=W_ATOL, rtol=W_RTOL)

    # --- larger self-attention exercising the flash S-tiling (2 key tiles),
    #     with and without the head-averaged weights output ---
    T2 = 256
    xb = jax.random.normal(kbig, (T2, bsz, embed_dim), jnp.float32)
    out_b, w_b = smha_forward(params, xb, xb, xb, num_heads,
                              need_weights=True, attn_tile_s=128)
    out_b = jax.block_until_ready(out_b)
    ref_out_b, ref_w_b = smha_reference(params, xb, xb, xb, num_heads)
    assert jnp.allclose(out_b, ref_out_b, atol=ATOL, rtol=RTOL)
    assert jnp.allclose(w_b, ref_w_b, atol=W_ATOL, rtol=W_RTOL)
    out_b2, _ = smha_forward(params, xb, xb, xb, num_heads,
                             need_weights=False, attn_tile_s=128)
    out_b2 = jax.block_until_ready(out_b2)
    assert jnp.allclose(out_b2, ref_out_b, atol=ATOL, rtol=RTOL)

    # --- direct test of the M/N/K-tiled linear kernel (f32 K-accumulator) ---
    kx, kw = jax.random.split(kbig)
    xl = jax.random.normal(kx, (256, 256), jnp.float32)
    wl = jax.random.normal(kw, (256, 384), jnp.float32) * 0.05
    bl = jnp.arange(384, dtype=jnp.float32) * 0.01
    yl = pallas_linear(xl, wl, bl, out_dtype=jnp.float32,
                       tile_m=128, tile_n=128, tile_k=128)
    yl = jax.block_until_ready(yl)
    assert jnp.allclose(yl, xl @ wl + bl, atol=ATOL, rtol=RTOL)

    print("KERNEL_OK")
</pallas_src>

<mosaic_0001>
module attributes {stable_mosaic.version = 11 : i64} {
  func.func @_linear_kernel(%arg0: i32, %arg1: i32, %arg2: i32, %arg3: memref<16x32xf32, #tpu.memory_space<vmem>>, %arg4: memref<32x96xbf16, #tpu.memory_space<vmem>>, %arg5: memref<1x96xf32, #tpu.memory_space<vmem>>, %arg6: memref<16x96xbf16, #tpu.memory_space<vmem>>, %arg7: memref<16x96xf32, #tpu.memory_space<vmem>>) attributes {dimension_semantics = [#tpu.dimension_semantics<parallel>, #tpu.dimension_semantics<parallel>, #tpu.dimension_semantics<arbitrary>], iteration_bounds = array<i64: 1, 1, 1>, scalar_prefetch = 0 : i64, scratch_operands = 1 : i64, tpu.core_type = #tpu.core_type<tc>, window_params = [{transform_indices = @transform_0, window_bounds = array<i64: 16, 32>}, {transform_indices = @transform_1, window_bounds = array<i64: 32, 96>}, {transform_indices = @transform_2, window_bounds = array<i64: 1, 96>}, {transform_indices = @transform_3, window_bounds = array<i64: 16, 96>}]} {
    %c0_i32 = arith.constant 0 : i32
    %0 = arith.cmpi eq, %arg2, %c0_i32 : i32
    %1 = arith.extui %0 : i1 to i32
    %c0_i32_0 = arith.constant 0 : i32
    %2 = arith.cmpi ne, %1, %c0_i32_0 : i32
    scf.if %2 {
      %cst_10 = arith.constant 0.000000e+00 : f32
      %13 = vector.broadcast %cst_10 : f32 to vector<16x96xf32>
      %c0_11 = arith.constant 0 : index
      %c0_12 = arith.constant 0 : index
      %14 = vector.load %arg7[%c0_11, %c0_12] : memref<16x96xf32, #tpu.memory_space<vmem>>, vector<16x96xf32>
      tpu.vector_store %arg7[%c0_11, %c0_12], %13 {strides = array<i32>} : memref<16x96xf32, #tpu.memory_space<vmem>>, vector<16x96xf32>,
    } else {
    }
    %c0 = arith.constant 0 : index
    %c0_1 = arith.constant 0 : index
    %3 = vector.load %arg7[%c0, %c0_1] : memref<16x96xf32, #tpu.memory_space<vmem>>, vector<16x96xf32>
    %c0_2 = arith.constant 0 : index
    %c0_3 = arith.constant 0 : index
    %4 = vector.load %arg3[%c0_2, %c0_3] : memref<16x32xf32, #tpu.memory_space<vmem>>, vector<16x32xf32>
    %5 = arith.truncf %4 : vector<16x32xf32> to vector<16x32xbf16>
    %c0_4 = arith.constant 0 : index
    %c0_5 = arith.constant 0 : index
    %6 = vector.load %arg4[%c0_4, %c0_5] : memref<32x96xbf16, #tpu.memory_space<vmem>>, vector<32x96xbf16>
    %cst = arith.constant dense<0.000000e+00> : vector<16x96xf32>
    %7 = tpu.matmul %5, %6, %cst {dimension_numbers = #tpu.dot_dimension_numbers<[1], [0], [0], [1], [0, 0, 1, 1], [], []>} : vector<16x32xbf16>, vector<32x96xbf16>, vector<16x96xf32> -> vector<16x96xf32>
    %8 = arith.addf %3, %7 : vector<16x96xf32>
    %c0_6 = arith.constant 0 : index
    %c0_7 = arith.constant 0 : index
    %9 = vector.load %arg7[%c0_6, %c0_7] : memref<16x96xf32, #tpu.memory_space<vmem>>, vector<16x96xf32>
    tpu.vector_store %arg7[%c0_6, %c0_7], %8 {strides = array<i32>} : memref<16x96xf32, #tpu.memory_space<vmem>>, vector<16x96xf32>,
    %c0_i32_8 = arith.constant 0 : i32
    %10 = arith.cmpi eq, %arg2, %c0_i32_8 : i32
    %11 = arith.extui %10 : i1 to i32
    %c0_i32_9 = arith.constant 0 : i32
    %12 = arith.cmpi ne, %11, %c0_i32_9 : i32
    scf.if %12 {
      %c0_10 = arith.constant 0 : index
      %c0_11 = arith.constant 0 : index
      %13 = vector.load %arg7[%c0_10, %c0_11] : memref<16x96xf32, #tpu.memory_space<vmem>>, vector<16x96xf32>
      %c0_12 = arith.constant 0 : index
      %c0_13 = arith.constant 0 : index
      %14 = vector.load %arg5[%c0_12, %c0_13] : memref<1x96xf32, #tpu.memory_space<vmem>>, vector<1x96xf32>
      %15 = vector.broadcast %14 : vector<1x96xf32> to vector<16x96xf32>
      %16 = arith.addf %13, %15 : vector<16x96xf32>
      %17 = arith.truncf %16 : vector<16x96xf32> to vector<16x96xbf16>
      %c0_14 = arith.constant 0 : index
      %c0_15 = arith.constant 0 : index
      %18 = vector.load %arg6[%c0_14, %c0_15] : memref<16x96xbf16, #tpu.memory_space<vmem>>, vector<16x96xbf16>
      tpu.vector_store %arg6[%c0_14, %c0_15], %17 {strides = array<i32>} : memref<16x96xbf16, #tpu.memory_space<vmem>>, vector<16x96xbf16>,
    } else {
    }
    return
  }
  func.func @transform_0(%arg0: i32, %arg1: i32, %arg2: i32) -> (i32, i32) {
    %c0_i32 = arith.constant 0 : i32
    return %arg0, %arg2 : i32, i32
  }
  func.func @transform_1(%arg0: i32, %arg1: i32, %arg2: i32) -> (i32, i32) {
    %c0_i32 = arith.constant 0 : i32
    return %arg2, %arg1 : i32, i32
  }
  func.func @transform_2(%arg0: i32, %arg1: i32, %arg2: i32) -> (i32, i32) {
    %c0_i32 = arith.constant 0 : i32
    %c0_i32_0 = arith.constant 0 : i32
    return %c0_i32, %arg1 : i32, i32
  }
  func.func @transform_3(%arg0: i32, %arg1: i32, %arg2: i32) -> (i32, i32) {
    %c0_i32 = arith.constant 0 : i32
    return %arg0, %arg1 : i32, i32
  }
}

</mosaic_0001>

<bundles_post_ra>
// kernel: tpu_custom_call.1
= control target key start
LH: loop header
LB: loop body
LE: loop exit
PB: predicated region body
PF: predicated region fallthrough
CT: control target
= control target key end

     0   :  { %8 = vsyncpa [#allocation4], 0  ;;  %s283_s0 = inlined_call_operand.hbm [shape: f32[16,32], index: 0, kind: input, shape index: {}]   ;;  %s284_s1 = inlined_call_operand.hbm [shape: bf16[32,96], index: 1, kind: input, shape index: {}]   ;;  %s285_s2 = inlined_call_operand.vmem [shape: f32[1,96], index: 2, kind: input, shape index: {}]   ;;  %s286_s3 = inlined_call_operand.hbm [shape: bf16[16,96], index: 3, kind: output, shape index: {}]  }
   0x1   :  { %9 = vsyncpa [#allocation7], 0 }
   0x2   :  { %10 = vsyncpa [#allocation5], 0  ;;  %s15_s14 = sshll.u32 %s283_s0, 4  ;;  %s233_s15 = smov [#allocation3]   ;;  %s16_s14 = int_to_ptr.hbm [resolvable:$true] %s15_s14 }
   0x3   :  { %s17_s16 = sshll.u32 %s233_s15, 4  ;;  %s28_s19 = sshll.u32 %s284_s1, 4  ;;  %s18_s16 = int_to_ptr.vmem [resolvable:$true] %s17_s16  ;;  %s29_s19 = int_to_ptr.hbm [resolvable:$true] %s28_s19 }
   0x4   :  { %s234_s20 = smov 128   ;;  %s235_s21 = smov 8  }
   0x5   :  { %23 = dma.hbm_to_vmem [thread:$0]  %s16_s14, 256, %s18_s16, [#allocation4], %s234_s20, %s234_s20, %s235_s21  }
   0x6   :  { %s236_s22 = smov [#allocation6]   ;;  %s237_s24 = smov 64  }
   0x7   :  { %s30_s23 = sshll.u32 %s236_s22, 4  ;;  %s238_s25 = smov 4   ;;  %s31_s23 = int_to_ptr.vmem [resolvable:$true] %s30_s23 }
   0x8   :  { %36 = dma.hbm_to_vmem [thread:$0]  %s29_s19, 256, %s31_s23, [#allocation7], %s237_s24, %s237_s24, %s238_s25  }
   0x9   :  { %227 = dma.done.wait [#allocation4], 256  }
   0xa   :  { %228 = vsyncadd [#allocation4], 4294967040 }
   0xb   :  { %229 = dma.done.wait [#allocation7], 256  }
   0xc   :  { %230 = vsyncadd [#allocation7], 4294967040  ;;  %vm52_vm0 = vcmask 785408   ;;  %v239_v0 = vmov 0.0   ;;  %v145_v1 = vld [vmem:[#allocation6 + $0x8] sm:$0xff]  ;;  %v144_v2 = vld [vmem:[#allocation6] sm:$0xff] }
   0xd   :  { %53 = vst.msk [vmem:[#allocation2] sm:$0xff] %vm52_vm0, %v239_v0  ;;  %86 = vmatpush.bf16.msra.mxu0 %v145_v1  ;;  %v57_v3 = vld [vmem:[#allocation3] sm:$0xff]  ;;  %v58_v4 = vld [vmem:[#allocation3 + $0x8] sm:$0xff]  ;;  %vm76_vm1 = vcmask 261120   ;;  %v154_v10 = vld [vmem:[%s285_s2] ss:$0 sm:$0xff] }
   0xe   :  { %54 = vst.msk [vmem:[#allocation2 + $0x8] sm:$0xff] %vm52_vm0, %v239_v0  ;;  %v59_v5 = vpack.c.bf16 %v58_v4, %v57_v3  ;;  %vm112_vm2 = vcmask 781312   ;;  %s240_s26 = smov [#allocation8]   ;;  %s121_s30 = sshll.u32 %s286_s3, 4  ;;  %s122_s30 = int_to_ptr.hbm [resolvable:$true] %s121_s30 }
   0xf   :  { %s119_s27 = sshll.u32 %s240_s26, 4  ;;  %s120_s27 = int_to_ptr.vmem [resolvable:$true] %s119_s27 }
  0x11   :  { %87 = vmatpush.bf16.msra.mxu0 %v144_v2 }
  0x14   :  { %143 = vmatmul.msk.bf16.vlgmr.msra.gmra.mxu0 %vm76_vm1, %v59_v5  ;;  %v55_v6 = vld [vmem:[#allocation2] sm:$0xff] }
  0x15   :  { %v56_v9 = vld [vmem:[#allocation2 + $0x8] sm:$0xff] }
  0x91   :  { %v89_v7 = vpop.f32.mrf.mxu0 }
  0x92   :  { %v94_v8 = vadd.f32 %v89_v7, %v55_v6 }
  0x94   :  { %97 = vst.msk [vmem:[#allocation2] sm:$0xff] %vm52_vm0, %v94_v8 }
  0x99   :  { %v91_v11 = vpop.f32.mrf.mxu0 }
  0x9a   :  { %v95_v12 = vadd.f32 %v91_v11, %v56_v9 }
  0x9b   :  { %v102_v13 = vld [vmem:[#allocation2] sm:$0xff] }
  0x9c   :  { %98 = vst.msk [vmem:[#allocation2 + $0x8] sm:$0xff] %vm52_vm0, %v95_v12  ;;  %v108_v14 = vadd.f32 %v154_v10, %v102_v13 }
  0x9e   :  { %v110_v15 = vpack.c.bf16 %v108_v14, %v108_v14 }
  0xa0   :  { %113 = vst.msk [vmem:[#allocation8] sm:$0xf] %vm112_vm2, %v110_v15 }
  0xa3   :  { %v103_v16 = vld [vmem:[#allocation2 + $0x8] sm:$0xff] }
  0xa4   :  { %v109_v17 = vadd.f32 %v154_v10, %v103_v16 }
  0xa6   :  { %v111_v18 = vpack.c.bf16 %v109_v17, %v109_v17 }
  0xa8   :  { %114 = vst.msk [vmem:[#allocation8 + $0x4] sm:$0xf] %vm112_vm2, %v111_v18 }
  0xa9   :  { %127 = dma.vmem_to_hbm [thread:$0]  %s120_s27, 128, %s122_s30, [#allocation5], %s237_s24, %s237_s24, %s238_s25  }
  0xaa   :  { %231 = dma.done.wait [#allocation5], 128  }
  0xab   :  { %232 = vsyncadd [#allocation5], 4294967168 }
  0xac   :  { %132 = vsyncpa [#allocation4], 1 }
  0xad   :  { %133 = vsyncpa [#allocation7], 1 }
  0xae   :  { %134 = vsyncpa [#allocation5], 1 }

</bundles_post_ra>
